<compile_context>
chip_gen: v7x
topology: tpu7x:2x2x1
jax: 0.10.0
libtpu: 0.0.40
codegen_flags: <defaults>
</compile_context>

<pallas_src>
import functools

import jax
import jax.numpy as jnp
from jax import lax
from jax.experimental import pallas as pl
from jax.experimental.pallas import tpu as pltpu


_LANES = 128
_X_BLOCK_BUDGET_BYTES = 4 * 1024 * 1024   # per x input buffer (2x when double-buffered)
_VMEM_LIMIT_BYTES = 32 * 1024 * 1024      # safe on v5e/v6e (128 MiB) and v7x (64 MiB)


# ----------------------------------------------------------------------------
# Fused kernel: spatial-sum reduction over the HW grid axis; on the last
# reduction step: selector-regroup + FC head (Normalize and 1/HW pre-folded
# into the weights) + masked softmax.
# ----------------------------------------------------------------------------
def detector_kernel(x_ref, w_rows_ref, sel_ref, b_ref, p_ref, acc_ref, *, num_classes):
    j = pl.program_id(1)                     # spatial reduction axis (last grid dim)

    @pl.when(j == 0)
    def _init():
        acc_ref[...] = jnp.zeros_like(acc_ref)

    # Per-row spatial partial sum for this (tile_rows, tile_hw) block.
    # The kernel is HBM-bandwidth bound by ~10x at the chosen block sizes, so
    # this VPU+XLU reduce is fully hidden under the input DMA.
    x = x_ref[...].astype(jnp.float32)                      # (tile_rows, tile_hw)
    acc_ref[...] += jnp.sum(x, axis=-1, keepdims=True)      # (tile_rows, 1)

    @pl.when(j == pl.num_programs(1) - 1)
    def _epilogue():
        # acc holds per-(image, channel) spatial sums; rows are batch-major /
        # channel-minor.  w_rows already folds Normalize's 1/std, the FC
        # weight and the 1/HW of the global average pool:
        #   contrib[r, k] = rowsum[r] * (inv_std[c] * W[c, k] / HW),  c = r % C
        # and the 0/1 selector matmul regroups rows to images:
        #   logits[i, k]  = sum_r sel[i, r] * contrib[r, k] + b_eff[k].
        contrib = acc_ref[...] * w_rows_ref[...]             # (R, 1)*(R, K_pad)
        logits = jnp.dot(sel_ref[...], contrib,
                         preferred_element_type=jnp.float32) + b_ref[...]
        if num_classes < logits.shape[-1]:
            col = lax.broadcasted_iota(jnp.int32, logits.shape, 1)
            logits = jnp.where(col < num_classes, logits, -jnp.inf)
        m = jnp.max(logits, axis=-1, keepdims=True)
        e = jnp.exp(logits - m)
        s = jnp.sum(e, axis=-1, keepdims=True)
        p_ref[...] = e * pl.reciprocal(s, approx=False)      # softmax(dim=1)


# ----------------------------------------------------------------------------
# Tile-size selection
# ----------------------------------------------------------------------------
def _pick_tile_n(n, c):
    """Images per block: a divisor t of N with (t*C) % 8 == 0 so the row block
    fills all 8 sublanes, preferring >= 2 blocks on the parallel axis
    (megacore).  Falls back to the full batch (block == full dim is legal)."""
    cands = [t for t in range(1, min(n, 64) + 1)
             if n % t == 0 and (t * c) % 8 == 0]
    if not cands:
        return n
    multi = [t for t in cands if n // t >= 2]
    return max(multi) if multi else max(cands)


def _pick_tile_hw(hw_pad, tile_rows, itemsize):
    """Largest lane-aligned (multiple-of-128) divisor of hw_pad that keeps the
    x input block within the per-buffer VMEM budget."""
    assert hw_pad % _LANES == 0
    q = hw_pad // _LANES
    max_elems = max(_LANES, _X_BLOCK_BUDGET_BYTES // (tile_rows * itemsize))
    dmax = max(1, min(q, max_elems // _LANES))
    for d in range(dmax, 0, -1):
        if q % d == 0:
            return d * _LANES
    return _LANES


# ----------------------------------------------------------------------------
# Wrapper
# ----------------------------------------------------------------------------
@jax.jit
def detector_forward(x_nchw, w, b):
    N, C, H, W = x_nchw.shape
    HW = H * W
    K = w.shape[1]

    # Fold Normalize (hoisted past the GAP) into the FC weights/bias:
    #   ((f - mu) * inv_std) @ W + b == f @ (inv_std[:,None]*W) + (b - (mu*inv_std)@W)
    mean = jnp.array([0.485, 0.456, 0.406], jnp.float32)
    inv_std = 1.0 / jnp.array([0.229, 0.224, 0.225], jnp.float32)
    w_f32 = w.astype(jnp.float32)
    w_eff = inv_std[:, None] * w_f32                               # (C, K)
    b_eff = b.astype(jnp.float32).reshape(1, K) - (mean * inv_std) @ w_f32

    # Pad classes to a multiple of 128 for lane-dense output stores.
    K_pad = ((K + _LANES - 1) // _LANES) * _LANES

    # 2-D image layout: (N*C, HW).  Keep the caller's dtype (uint8/bf16/f32);
    # the kernel upcasts to f32 when loading, so HBM reads stay narrow.
    x2 = x_nchw.reshape(N * C, HW)
    HW_pad = ((HW + _LANES - 1) // _LANES) * _LANES
    if HW_pad != HW:
        # Zero-pad the spatial axis; zeros don't change the sums and we divide
        # by the true HW (folded into w_rows), so this is exact.
        x2 = jnp.pad(x2, ((0, 0), (0, HW_pad - HW)))

    tile_n = _pick_tile_n(N, C)
    tile_rows = tile_n * C
    tile_hw = _pick_tile_hw(HW_pad, tile_rows, jnp.dtype(x2.dtype).itemsize)
    grid = (N // tile_n, HW_pad // tile_hw)

    # Row-replicated weights (row r -> channel r % C) with 1/HW folded in,
    # padded to K_pad lanes, and a 0/1 selector regrouping rows -> images.
    w_rows = jnp.tile(w_eff / HW, (tile_n, 1))                     # (tile_rows, K)
    w_rows = jnp.zeros((tile_rows, K_pad), jnp.float32).at[:, :K].set(w_rows)
    b_p = jnp.zeros((1, K_pad), jnp.float32).at[:, :K].set(b_eff)
    row_ids = jnp.arange(tile_rows, dtype=jnp.int32) // C
    sel = (row_ids[None, :] == jnp.arange(tile_n, dtype=jnp.int32)[:, None]
           ).astype(jnp.float32)                                   # (tile_n, tile_rows)

    probs_padded = pl.pallas_call(
        functools.partial(detector_kernel, num_classes=K),
        out_shape=jax.ShapeDtypeStruct((N, K_pad), jnp.float32),
        grid=grid,
        in_specs=[
            pl.BlockSpec((tile_rows, tile_hw), lambda i, j: (i, j)),
            # Tiny resident constants (few KiB; default double-buffering is
            # negligible, so no pl.Buffered(1) special-casing).
            pl.BlockSpec((tile_rows, K_pad), lambda i, j: (0, 0)),
            pl.BlockSpec((tile_n, tile_rows), lambda i, j: (0, 0)),
            pl.BlockSpec((1, K_pad), lambda i, j: (0, 0)),
        ],
        out_specs=pl.BlockSpec((tile_n, K_pad), lambda i, j: (i, 0)),
        scratch_shapes=[pltpu.VMEM((tile_rows, 1), jnp.float32)],
        compiler_params=pltpu.CompilerParams(
            dimension_semantics=("parallel", "arbitrary"),
            vmem_limit_bytes=_VMEM_LIMIT_BYTES),
    )(x2, w_rows, sel, b_p)

    return probs_padded[:, :K]


# ----------------------------------------------------------------------------
# Pure-JAX reference (original formulation) for correctness checking
# ----------------------------------------------------------------------------
def detector_reference(x_nchw, w, b):
    mean = jnp.array([0.485, 0.456, 0.406], jnp.float32).reshape(1, 3, 1, 1)
    std = jnp.array([0.229, 0.224, 0.225], jnp.float32).reshape(1, 3, 1, 1)
    y = (x_nchw - mean) / std
    feat = jnp.mean(y, axis=(2, 3))                 # GAP stand-in model
    logits = feat @ w + b
    return jax.nn.softmax(logits, axis=1)


if __name__ == "__main__":
    key = jax.random.PRNGKey(0)
    k_x, k_w, k_b = jax.random.split(key, 3)

    N, C, H, W = 2, 3, 16, 16      # 3 channels to match Normalize mean/std
    K = 10                         # number of detector classes

    x = jax.random.uniform(k_x, (N, C, H, W), dtype=jnp.float32)    # image in [0,1]
    w = 0.1 * jax.random.normal(k_w, (C, K), dtype=jnp.float32)     # deterministic init
    b = 0.01 * jax.random.normal(k_b, (1, K), dtype=jnp.float32)

    probs = jax.block_until_ready(detector_forward(x, w, b))
    ref = detector_reference(x, w, b)

    assert probs.shape == (N, K)
    assert jnp.allclose(jnp.sum(probs, axis=1), 1.0, atol=1e-5)
    assert jnp.allclose(probs, ref, atol=1e-5, rtol=1e-5)
    print("KERNEL_OK")
</pallas_src>

<mosaic_0001>
module attributes {stable_mosaic.version = 11 : i64} {
  func.func @detector_kernel(%arg0: i32, %arg1: i32, %arg2: memref<6x256xf32, #tpu.memory_space<vmem>>, %arg3: memref<6x128xf32, #tpu.memory_space<vmem>>, %arg4: memref<2x6xf32, #tpu.memory_space<vmem>>, %arg5: memref<1x128xf32, #tpu.memory_space<vmem>>, %arg6: memref<2x128xf32, #tpu.memory_space<vmem>>, %arg7: memref<6x1xf32, #tpu.memory_space<vmem>>) attributes {dimension_semantics = [#tpu.dimension_semantics<parallel>, #tpu.dimension_semantics<arbitrary>], iteration_bounds = array<i64: 1, 1>, scalar_prefetch = 0 : i64, scratch_operands = 1 : i64, tpu.core_type = #tpu.core_type<tc>, window_params = [{transform_indices = @transform_0, window_bounds = array<i64: 6, 256>}, {pipeline_mode = #tpu.pipeline_mode<synchronous>, transform_indices = @transform_1, window_bounds = array<i64: 6, 128>}, {pipeline_mode = #tpu.pipeline_mode<synchronous>, transform_indices = @transform_2, window_bounds = array<i64: 2, 6>}, {pipeline_mode = #tpu.pipeline_mode<synchronous>, transform_indices = @transform_3, window_bounds = array<i64: 1, 128>}, {transform_indices = @transform_4, window_bounds = array<i64: 2, 128>}]} {
    %c0_i32 = arith.constant 0 : i32
    %0 = arith.cmpi eq, %arg1, %c0_i32 : i32
    %1 = arith.extui %0 : i1 to i32
    %c0_i32_0 = arith.constant 0 : i32
    %2 = arith.cmpi ne, %1, %c0_i32_0 : i32
    scf.if %2 {
      %cst_8 = arith.constant 0.000000e+00 : f32
      %12 = vector.broadcast %cst_8 : f32 to vector<6x1xf32>
      %c0_9 = arith.constant 0 : index
      %c0_10 = arith.constant 0 : index
      %13 = vector.load %arg7[%c0_9, %c0_10] : memref<6x1xf32, #tpu.memory_space<vmem>>, vector<6x1xf32>
      tpu.vector_store %arg7[%c0_9, %c0_10], %12 {strides = array<i32>} : memref<6x1xf32, #tpu.memory_space<vmem>>, vector<6x1xf32>,
    } else {
    }
    %c0 = arith.constant 0 : index
    %c0_1 = arith.constant 0 : index
    %3 = vector.load %arg2[%c0, %c0_1] : memref<6x256xf32, #tpu.memory_space<vmem>>, vector<6x256xf32>
    %c0_2 = arith.constant 0 : index
    %c0_3 = arith.constant 0 : index
    %4 = vector.load %arg7[%c0_2, %c0_3] : memref<6x1xf32, #tpu.memory_space<vmem>>, vector<6x1xf32>
    %cst = arith.constant dense<0.000000e+00> : vector<6xf32>
    %5 = vector.multi_reduction <add>, %3, %cst [1] : vector<6x256xf32> to vector<6xf32>
    %6 = vector.shape_cast %5 : vector<6xf32> to vector<6x1xf32>
    %7 = arith.addf %4, %6 : vector<6x1xf32>
    %c0_4 = arith.constant 0 : index
    %c0_5 = arith.constant 0 : index
    %8 = vector.load %arg7[%c0_4, %c0_5] : memref<6x1xf32, #tpu.memory_space<vmem>>, vector<6x1xf32>
    tpu.vector_store %arg7[%c0_4, %c0_5], %7 {strides = array<i32>} : memref<6x1xf32, #tpu.memory_space<vmem>>, vector<6x1xf32>,
    %c0_i32_6 = arith.constant 0 : i32
    %9 = arith.cmpi eq, %arg1, %c0_i32_6 : i32
    %10 = arith.extui %9 : i1 to i32
    %c0_i32_7 = arith.constant 0 : i32
    %11 = arith.cmpi ne, %10, %c0_i32_7 : i32
    scf.if %11 {
      %c0_8 = arith.constant 0 : index
      %c0_9 = arith.constant 0 : index
      %12 = vector.load %arg7[%c0_8, %c0_9] : memref<6x1xf32, #tpu.memory_space<vmem>>, vector<6x1xf32>
      %c0_10 = arith.constant 0 : index
      %c0_11 = arith.constant 0 : index
      %13 = vector.load %arg3[%c0_10, %c0_11] : memref<6x128xf32, #tpu.memory_space<vmem>>, vector<6x128xf32>
      %14 = vector.broadcast %12 : vector<6x1xf32> to vector<6x128xf32>
      %15 = arith.mulf %14, %13 : vector<6x128xf32>
      %c0_12 = arith.constant 0 : index
      %c0_13 = arith.constant 0 : index
      %16 = vector.load %arg4[%c0_12, %c0_13] : memref<2x6xf32, #tpu.memory_space<vmem>>, vector<2x6xf32>
      %cst_14 = arith.constant dense<0.000000e+00> : vector<2x128xf32>
      %17 = tpu.matmul %16, %15, %cst_14 {dimension_numbers = #tpu.dot_dimension_numbers<[1], [0], [0], [1], [0, 0, 1, 1], [], []>} : vector<2x6xf32>, vector<6x128xf32>, vector<2x128xf32> -> vector<2x128xf32>
      %c0_15 = arith.constant 0 : index
      %c0_16 = arith.constant 0 : index
      %18 = vector.load %arg5[%c0_15, %c0_16] : memref<1x128xf32, #tpu.memory_space<vmem>>, vector<1x128xf32>
      %19 = vector.broadcast %18 : vector<1x128xf32> to vector<2x128xf32>
      %20 = arith.addf %17, %19 : vector<2x128xf32>
      %21 = tpu.iota {dimensions = array<i32: 1>} : vector<2x128xi32>
      %c10_i32 = arith.constant 10 : i32
      %22 = vector.broadcast %c10_i32 : i32 to vector<2x128xi32>
      %23 = arith.cmpi slt, %21, %22 : vector<2x128xi32>
      %cst_17 = arith.constant 0xFF800000 : f32
      %24 = vector.broadcast %cst_17 : f32 to vector<2x128xf32>
      %25 = arith.select %23, %20, %24 : vector<2x128xi1>, vector<2x128xf32>
      %cst_18 = arith.constant dense<0xFF800000> : vector<2xf32>
      %26 = vector.multi_reduction <maximumf>, %25, %cst_18 [1] : vector<2x128xf32> to vector<2xf32>
      %27 = vector.shape_cast %26 : vector<2xf32> to vector<2x1xf32>
      %28 = vector.broadcast %27 : vector<2x1xf32> to vector<2x128xf32>
      %29 = arith.subf %25, %28 : vector<2x128xf32>
      %30 = math.exp %29 : vector<2x128xf32>
      %cst_19 = arith.constant dense<0.000000e+00> : vector<2xf32>
      %31 = vector.multi_reduction <add>, %30, %cst_19 [1] : vector<2x128xf32> to vector<2xf32>
      %32 = vector.shape_cast %31 : vector<2xf32> to vector<2x1xf32>
      %33 = tpu.reciprocal %32 : vector<2x1xf32> -> vector<2x1xf32>
      %34 = vector.broadcast %33 : vector<2x1xf32> to vector<2x128xf32>
      %35 = arith.mulf %30, %34 : vector<2x128xf32>
      %c0_20 = arith.constant 0 : index
      %c0_21 = arith.constant 0 : index
      %36 = vector.load %arg6[%c0_20, %c0_21] : memref<2x128xf32, #tpu.memory_space<vmem>>, vector<2x128xf32>
      tpu.vector_store %arg6[%c0_20, %c0_21], %35 {strides = array<i32>} : memref<2x128xf32, #tpu.memory_space<vmem>>, vector<2x128xf32>,
    } else {
    }
    return
  }
  func.func @transform_0(%arg0: i32, %arg1: i32) -> (i32, i32) {
    %c0_i32 = arith.constant 0 : i32
    return %arg0, %arg1 : i32, i32
  }
  func.func @transform_1(%arg0: i32, %arg1: i32) -> (i32, i32) {
    %c0_i32 = arith.constant 0 : i32
    %c0_i32_0 = arith.constant 0 : i32
    %c0_i32_1 = arith.constant 0 : i32
    return %c0_i32, %c0_i32_0 : i32, i32
  }
  func.func @transform_2(%arg0: i32, %arg1: i32) -> (i32, i32) {
    %c0_i32 = arith.constant 0 : i32
    %c0_i32_0 = arith.constant 0 : i32
    %c0_i32_1 = arith.constant 0 : i32
    return %c0_i32, %c0_i32_0 : i32, i32
  }
  func.func @transform_3(%arg0: i32, %arg1: i32) -> (i32, i32) {
    %c0_i32 = arith.constant 0 : i32
    %c0_i32_0 = arith.constant 0 : i32
    %c0_i32_1 = arith.constant 0 : i32
    return %c0_i32, %c0_i32_0 : i32, i32
  }
  func.func @transform_4(%arg0: i32, %arg1: i32) -> (i32, i32) {
    %c0_i32 = arith.constant 0 : i32
    %c0_i32_0 = arith.constant 0 : i32
    return %arg0, %c0_i32 : i32, i32
  }
}

</mosaic_0001>

<bundles_post_ra>
// kernel: detector_forward.1
= control target key start
LH: loop header
LB: loop body
LE: loop exit
PB: predicated region body
PF: predicated region fallthrough
CT: control target
= control target key end

     0   :  { %vm27_vm0 = vcmask 1045504   ;;  %s265_s0 = inlined_call_operand.vmem [shape: f32[6,256], index: 0, kind: input, shape index: {}]   ;;  %s266_s1 = inlined_call_operand.vmem [shape: f32[6,128], index: 1, kind: input, shape index: {}]   ;;  %s267_s2 = inlined_call_operand.vmem [shape: f32[2,6], index: 2, kind: input, shape index: {}]   ;;  %s268_s3 = inlined_call_operand.vmem [shape: f32[1,128], index: 3, kind: input, shape index: {}]   ;;  %s269_s4 = inlined_call_operand.hbm [shape: f32[2,128], index: 4, kind: output, shape index: {}]  }
   0x1   :  { %v24_v0 = vld [vmem:[%s265_s0] sm:$0x3f]  ;;  %v25_v1 = vld [vmem:[%s265_s0 + $0x8] sm:$0x3f] }
   0x2   :  { %v28_v2 = vsel %vm27_vm0, %v24_v0, 0.0  ;;  %v29_v3 = vsel %vm27_vm0, %v25_v1, 0.0 }
   0x3   :  { %9 = vsyncpa [#allocation4], 0  ;;  %v30_v4 = vadd.f32 %v29_v3, %v28_v2  ;;  %vm22_vm1 = vcmask 5120   ;;  %v206_v5 = vmov 0.0   ;;  %v207_v6 = vmov 0  }
   0x4   :  { %23 = vst.msk [vmem:[#allocation2] sm:$0x3f] %vm22_vm1, %v206_v5  ;;  %168 = vmatprep.subr.mxu0 %v206_v5  ;;  %177 = vset.pattern.permute.xlu0 %v207_v6  ;;  %vm208_vm2 = vmmov 0   ;;  %v40_v11 = vld [vmem:[%s266_s1] sm:$0x3f]  ;;  %vm55_vm3 = vcmask 48128   ;;  %v132_v15 = vlaneseq }
   0x5   :  { %31 = vadd.xlane.f32.xlu0 %v30_v4  ;;  %170 = vmatprep.mubr.msk.f32.mxu0 %vm208_vm2, %v206_v5  ;;  %v47_v14 = vld [vmem:[%s267_s2] sm:$0x3]  ;;  %vm136_vm5 = vcmask 1041408   ;;  %s209_s1 = smov [#allocation3]  }
   0x6   :  { %v133_v16 = vand.u32 127, %v132_v15  ;;  %v163_v17 = vld [vmem:[%s268_s3] ss:$0 sm:$0xff]  ;;  %s155_s2 = sshll.u32 %s209_s1, 4  ;;  %s156_s2 = int_to_ptr.vmem [resolvable:$true] %s155_s2 }
   0x7   :  { %s182_s3 = scalar_lea.vmem %s156_s2, 32  ;;  %p187_p1 = scmp.lt.s32.totalorder %s156_s2, %s156_s2 }
   0x8   :  { %vm134_vm4 = vcmp.lt.s32.totalorder %v133_v16, 10  ;;  %p183_p0 = scmp.ne.s32.totalorder %s156_s2, %s182_s3  ;;  %p188_p2 = scmp.lt.s32.totalorder %s182_s3, %s182_s3 }
   0xa   :  { %p189_p3 = por %p188_p2, %p187_p1 }
   0xb   :  { %v26_v7 = vld [vmem:[#allocation2] sm:$0x3f] }
   0xc   :  { %p190_p4 = pnand %p189_p3, %p183_p0 }
  0x92   :  { %v32_v8 = vpop.xlane.xlu0 %31 }
  0x93   :  { %v33_v9 = vadd.f32 %v32_v8, %v26_v7 }
  0x95   :  { %35 = vst.msk [vmem:[#allocation2] sm:$0x3f] %vm22_vm1, %v33_v9 }
  0x9c   :  { %v39_v10 = vld [vmem:[#allocation2] sm:$0x3f] }
  0x9d   :  { %43 = vperm.xlu0 %177, %v39_v10  }
 0x11c   :  { %v44_v12 = vpop.permute.xlu0 %43 }
 0x11d   :  { %v46_v13 = vmul.f32 %v44_v12, %v40_v11 }
 0x11f   :  { %169 = vmatpush3.msk.msra.mxu0 %vm27_vm0, %v46_v13 }
 0x120   :  { %171 = vmatmul.mubr.msk.f32.vlgmr.msra.gmra.mrb[0].mxu0 %vm55_vm3, %v47_v14 }
 0x1f3   :  { %v128_v18 = vpop.f32.mrb[0].mxu0 }
 0x1f4   :  { %v129_v19 = vadd.f32 %v163_v17, %v128_v18  ;;  %v172_v20 = vpop.f32.mrb[1].mxu0 }
 0x1f6   :  { %v135_v21 = vsel %vm134_vm4, %v129_v19, -inf }
 0x1f7   :  { %v137_v22 = vsel %vm136_vm5, %v135_v21, -inf }
 0x1f8   :  { %138 = vmax.xlane.f32.xlu1 %v137_v22 }
 0x285   :  { %v139_v23 = vpop.xlane.xlu1 %138 }
 0x286   :  { %v140_v24 = vsub.f32 %v135_v21, %v139_v23 }
 0x288   :  { %v141_v25 = vmul.f32 1.442695, %v140_v24 }
 0x28a   :  { %178 = vpow2.f32 %v141_v25 }
 0x294   :  { %v179_v26 = vpop.eup %178 }
 0x295   :  { %v143_v27 = vsel %vm136_vm5, %v179_v26, 0.0 }
 0x296   :  { %144 = vadd.xlane.f32.xlu1 %v143_v27 }
 0x323   :  { %v145_v28 = vpop.xlane.xlu1 %144 }
 0x324   :  { %180 = vrcp.f32 %v145_v28 }
 0x32e   :  { %v181_v29 = vpop.eup %180 }
 0x32f   :  { %v147_v30 = vmul.f32 %v181_v29, %v179_v26 }
 0x331   :  { %148 = vst [vmem:[#allocation3] sm:$0x3] %v147_v30 }
 0x332   :  { %193 = shalt.err (!%p190_p4)
}
 0x333   :  { %s194_s26 = scalar_lea.hbm %s269_s4, 32 }
 0x334   :  { %p195_p5 = scmp.ne.s32.totalorder %s269_s4, %s194_s26  ;;  %p198_p6 = scmp.lt.u32.totalorder %s194_s26, %s269_s4 }
 0x336   :  { %p200_p7 = pnand %p198_p6, %p195_p5 }
 0x338   :  { %203 = shalt.err (!%p200_p7)
}
 0x339   :  { %158 = dma.vmem_to_hbm [thread:$0]  %s156_s2, 32, %s269_s4, [#allocation4]  }
 0x33a   :  { %204 = dma.done.wait [#allocation4], 32  }
 0x33b   :  { %205 = vsyncadd [#allocation4], 4294967264 }
 0x33c   :  { %162 = vsyncpa [#allocation4], 1 }

</bundles_post_ra>
